<compile_context>
chip_gen: v6e
topology: v6e:2x2x1
jax: 0.10.0
libtpu: 0.0.40
codegen_flags: <defaults>
</compile_context>

<pallas_src>
import functools

import jax
import jax.numpy as jnp
from jax.experimental import pallas as pl
from jax.experimental.pallas import tpu as pltpu


def _ce_partial_sum_kernel(logits_ref, target_ref, psum_ref, *,
                           total_rows: int, block_rows: int):
    """One batch tile: psum_ref <- sum_r nll(logits[r, :], target[r])."""
    i = pl.program_id(0)

    x = logits_ref[...]                                 # (TB, C), native dtype (f32 or bf16)
    t = target_ref[...]                                 # (TB, 1) int32
    tb, c = x.shape

    # --- label gather on the raw tile (exact in bf16); upcast only the (TB, 1) result
    col = jax.lax.broadcasted_iota(jnp.int32, (tb, c), 1)                    # (TB, C)
    picked = jnp.sum(jnp.where(col == t, x, jnp.zeros_like(x)),
                     axis=-1, keepdims=True).astype(jnp.float32)             # (TB, 1)

    # --- numerically stable log-sum-exp in f32 (differences need f32 accuracy)
    xf = x.astype(jnp.float32)                                               # (TB, C)
    row_max = jnp.max(xf, axis=-1, keepdims=True)                            # (TB, 1)
    lse = row_max + jnp.log(jnp.sum(jnp.exp(xf - row_max),
                                    axis=-1, keepdims=True))                 # (TB, 1)

    nll = lse - picked                                                       # (TB, 1)

    # --- mask padded rows of a (possibly partial) last tile.
    #     Keep the select form: it discards NaN/Inf coming from the garbage rows.
    row = jax.lax.broadcasted_iota(jnp.int32, (tb, 1), 0)
    valid = (i * block_rows + row) < total_rows
    nll = jnp.where(valid, nll, 0.0)

    # per-tile partial sum -> this tile's (1, 1, 1) output block
    psum_ref[0] = jnp.sum(nll, axis=0, keepdims=True)                        # (1, 1)


def _vmem_capacity_bytes() -> int:
    """Trace-time VMEM capacity query; conservative (v7x-sized) fallback."""
    try:
        info = pltpu.get_tpu_info()
        cap = getattr(info, "vmem_capacity_bytes", None)
        if cap:
            return int(cap)
    except Exception:
        pass
    return 64 * 1024 * 1024


def lga_loss(output: jax.Array, target: jax.Array, gamma: float,
             *, block_rows: int | None = None) -> jax.Array:
    """output: (B, C) logits (f32 or bf16), target: (B,) int labels -> scalar f32."""
    b, c = output.shape
    target2d = target.astype(jnp.int32).reshape(b, 1)
    dsize = jnp.dtype(output.dtype).itemsize
    sub = max(8, 32 // dsize)                 # sublane multiple: 8 f32, 16 bf16, 32 int8

    # --- generation-aware budgets -------------------------------------------------
    vmem_cap = _vmem_capacity_bytes()
    if vmem_cap >= 100 * 1024 * 1024:         # v5e / v6e: 128 MiB physical VMEM
        buf_budget = 16 * 1024 * 1024         # per logits buffer (double-buffered)
        vmem_limit = 100 * 1024 * 1024
    else:                                     # v7x: 64 MiB VMEM per TensorCore
        buf_budget = 8 * 1024 * 1024
        vmem_limit = 56 * 1024 * 1024

    if block_rows is None:
        # (a) one double-buffered logits buffer within the per-buffer budget
        rows_from_buf = buf_budget // (c * dsize)
        # (b) total residency: 2x input tile + ~4 f32-sized intermediates
        #     (f32 upcast, exp, iota, select) must stay under the VMEM limit
        per_row_bytes = 2 * c * dsize + 4 * c * 4
        rows_from_vmem = int(vmem_limit * 0.8) // per_row_bytes
        block_rows = max(1, min(rows_from_buf, rows_from_vmem))
        # TODO(synk): if even `sub` rows exceed the budget (vocab-scale C), the
        #             class-axis online-LSE tiling from the header TODO is needed.

    # --- tile rounding / grid sizing ----------------------------------------------
    if block_rows >= b:
        # whole batch fits in one tile; still split into >= 2 tiles so the
        # "parallel" grid axis can feed both TensorCores on v7x.
        if b >= 2 * sub:
            tb = ((pl.cdiv(b, 2) + sub - 1) // sub) * sub
        else:
            tb = b
    else:
        tb = max(sub, (block_rows // sub) * sub)
    tb = min(tb, b)                           # tb is a sublane multiple or the full batch
    num_tiles = pl.cdiv(b, tb)

    kernel = functools.partial(_ce_partial_sum_kernel,
                               total_rows=b, block_rows=tb)

    cost = pl.CostEstimate(
        flops=6 * b * c,                       # max/sub/cmp/select/sums per element
        transcendentals=b * c + b,             # exp per element + log per row
        bytes_accessed=b * c * dsize + b * 4 + num_tiles * 4,
    )

    partial = pl.pallas_call(
        kernel,
        out_shape=jax.ShapeDtypeStruct((num_tiles, 1, 1), jnp.float32),
        grid_spec=pl.GridSpec(
            grid=(num_tiles,),
            in_specs=[
                pl.BlockSpec((tb, c), lambda i: (i, 0)),   # logits row-tile
                pl.BlockSpec((tb, 1), lambda i: (i, 0)),   # matching targets
            ],
            out_specs=pl.BlockSpec((1, 1, 1), lambda i: (i, 0, 0)),
        ),
        compiler_params=pltpu.CompilerParams(
            dimension_semantics=("parallel",),             # megacore-friendly on v7x
            vmem_limit_bytes=vmem_limit,
        ),
        cost_estimate=cost,
    )(output, target2d)

    # final scalar math (3 flops): mean CE, then LGA transform
    loss = jnp.sum(partial) / jnp.float32(b)
    return jnp.sign(loss - jnp.float32(gamma)) * loss


def _reference_lga_loss(output, target, gamma):
    # plain-JAX reference: CrossEntropyLoss(mean) + sign(loss - gamma) * loss
    logp = jax.nn.log_softmax(output.astype(jnp.float32), axis=-1)
    nll = -jnp.take_along_axis(logp, target[:, None].astype(jnp.int32), axis=-1)
    loss = jnp.mean(nll)
    return jnp.sign(loss - gamma) * loss


if __name__ == "__main__":
    key = jax.random.PRNGKey(0)
    k_logits, k_labels = jax.random.split(key)

    B, C = 20, 128                # batch (non-multiple of 8 -> exercises masking), classes
    gamma = 0.5

    logits = jax.random.normal(k_logits, (B, C), dtype=jnp.float32)
    labels = jax.random.randint(k_labels, (B,), 0, C, dtype=jnp.int32)

    ref = _reference_lga_loss(logits, labels, gamma)

    # f32 path, forced small tiles: 3 tiles, last one partial -> exercises masking
    loss_small = lga_loss(logits, labels, gamma, block_rows=8)
    jax.block_until_ready(loss_small)
    assert jnp.allclose(loss_small, ref, atol=1e-5, rtol=1e-5), (loss_small, ref)

    # f32 path, automatic generation-aware tiling (whole batch split into >= 2 tiles)
    loss_auto = lga_loss(logits, labels, gamma)
    jax.block_until_ready(loss_auto)
    assert jnp.allclose(loss_auto, ref, atol=1e-5, rtol=1e-5), (loss_auto, ref)

    # bf16 path (HBM-traffic-halving input; TB rounds to the bf16 sublane multiple 16)
    logits_bf16 = logits.astype(jnp.bfloat16)
    ref_bf16 = _reference_lga_loss(logits_bf16.astype(jnp.float32), labels, gamma)
    loss_bf16 = lga_loss(logits_bf16, labels, gamma, block_rows=8)
    jax.block_until_ready(loss_bf16)
    assert jnp.allclose(loss_bf16, ref_bf16, atol=1e-4, rtol=1e-4), (loss_bf16, ref_bf16)

    print("KERNEL_OK")
</pallas_src>

<mosaic_0001>
module attributes {stable_mosaic.version = 11 : i64} {
  func.func @_ce_partial_sum_kernel(%arg0: i32, %arg1: memref<8x128xf32, #tpu.memory_space<vmem>>, %arg2: memref<8x1xi32, #tpu.memory_space<vmem>>, %arg3: memref<1x1x1xf32, #tpu.memory_space<vmem>>) attributes {dimension_semantics = [#tpu.dimension_semantics<parallel>], iteration_bounds = array<i64: 3>, scalar_prefetch = 0 : i64, scratch_operands = 0 : i64, tpu.core_type = #tpu.core_type<tc>, window_params = [{transform_indices = @transform_0, window_bounds = array<i64: 8, 128>}, {transform_indices = @transform_1, window_bounds = array<i64: 8, 1>}, {transform_indices = @transform_2, window_bounds = array<i64: 1, 1, 1>}]} {
    %c0 = arith.constant 0 : index
    %c0_0 = arith.constant 0 : index
    %0 = vector.load %arg1[%c0, %c0_0] : memref<8x128xf32, #tpu.memory_space<vmem>>, vector<8x128xf32>
    %c0_1 = arith.constant 0 : index
    %c0_2 = arith.constant 0 : index
    %1 = vector.load %arg2[%c0_1, %c0_2] : memref<8x1xi32, #tpu.memory_space<vmem>>, vector<8x1xi32>
    %2 = tpu.iota {dimensions = array<i32: 1>} : vector<8x128xi32>
    %3 = vector.broadcast %1 : vector<8x1xi32> to vector<8x128xi32>
    %4 = arith.cmpi eq, %2, %3 : vector<8x128xi32>
    %cst = arith.constant 0.000000e+00 : f32
    %5 = vector.broadcast %cst : f32 to vector<8x128xf32>
    %6 = arith.select %4, %0, %5 : vector<8x128xi1>, vector<8x128xf32>
    %cst_3 = arith.constant dense<0.000000e+00> : vector<8xf32>
    %7 = vector.multi_reduction <add>, %6, %cst_3 [1] : vector<8x128xf32> to vector<8xf32>
    %8 = vector.shape_cast %7 : vector<8xf32> to vector<8x1xf32>
    %cst_4 = arith.constant dense<0xFF800000> : vector<8xf32>
    %9 = vector.multi_reduction <maximumf>, %0, %cst_4 [1] : vector<8x128xf32> to vector<8xf32>
    %10 = vector.shape_cast %9 : vector<8xf32> to vector<8x1xf32>
    %11 = vector.broadcast %10 : vector<8x1xf32> to vector<8x128xf32>
    %12 = arith.subf %0, %11 : vector<8x128xf32>
    %13 = math.exp %12 : vector<8x128xf32>
    %cst_5 = arith.constant dense<0.000000e+00> : vector<8xf32>
    %14 = vector.multi_reduction <add>, %13, %cst_5 [1] : vector<8x128xf32> to vector<8xf32>
    %15 = vector.shape_cast %14 : vector<8xf32> to vector<8x1xf32>
    %16 = math.log %15 : vector<8x1xf32>
    %17 = arith.addf %10, %16 : vector<8x1xf32>
    %18 = arith.subf %17, %8 : vector<8x1xf32>
    %19 = tpu.iota {dimensions = array<i32: 0>} : vector<8x1xi32>
    %c8_i32 = arith.constant 8 : i32
    %20 = arith.muli %arg0, %c8_i32 : i32
    %21 = vector.broadcast %20 : i32 to vector<8x1xi32>
    %22 = arith.addi %21, %19 : vector<8x1xi32>
    %c20_i32 = arith.constant 20 : i32
    %23 = vector.broadcast %c20_i32 : i32 to vector<8x1xi32>
    %24 = arith.cmpi slt, %22, %23 : vector<8x1xi32>
    %cst_6 = arith.constant 0.000000e+00 : f32
    %25 = vector.broadcast %cst_6 : f32 to vector<8x1xf32>
    %26 = arith.select %24, %18, %25 : vector<8x1xi1>, vector<8x1xf32>
    %cst_7 = arith.constant dense<0.000000e+00> : vector<1xf32>
    %27 = vector.multi_reduction <add>, %26, %cst_7 [0] : vector<8x1xf32> to vector<1xf32>
    %28 = vector.shape_cast %27 : vector<1xf32> to vector<1x1xf32>
    %c0_8 = arith.constant 0 : index
    %c0_9 = arith.constant 0 : index
    %c0_10 = arith.constant 0 : index
    %29 = vector.load %arg3[%c0_8, %c0_9, %c0_10] : memref<1x1x1xf32, #tpu.memory_space<vmem>>, vector<1x1x1xf32>
    %30 = vector.shape_cast %29 : vector<1x1x1xf32> to vector<1x1xf32>
    %31 = vector.shape_cast %28 : vector<1x1xf32> to vector<1x1x1xf32>
    tpu.vector_store %arg3[%c0_8, %c0_9, %c0_10], %31 {strides = array<i32>} : memref<1x1x1xf32, #tpu.memory_space<vmem>>, vector<1x1x1xf32>,
    return
  }
  func.func @transform_0(%arg0: i32) -> (i32, i32) {
    %c0_i32 = arith.constant 0 : i32
    %c0_i32_0 = arith.constant 0 : i32
    return %arg0, %c0_i32 : i32, i32
  }
  func.func @transform_1(%arg0: i32) -> (i32, i32) {
    %c0_i32 = arith.constant 0 : i32
    %c0_i32_0 = arith.constant 0 : i32
    return %arg0, %c0_i32 : i32, i32
  }
  func.func @transform_2(%arg0: i32) -> (i32, i32, i32) {
    %c0_i32 = arith.constant 0 : i32
    %c0_i32_0 = arith.constant 0 : i32
    %c0_i32_1 = arith.constant 0 : i32
    return %arg0, %c0_i32, %c0_i32_0 : i32, i32, i32
  }
}

</mosaic_0001>

<bundles_post_ra>
// kernel: tpu_custom_call.1
= control target key start
LH: loop header
LB: loop body
LE: loop exit
PB: predicated region body
PF: predicated region fallthrough
CT: control target
= control target key end

     0   :  { %s298_s9 = smov 0   ;;  %s327_s0 = inlined_call_operand.vmem [shape: f32[20,128], index: 0, kind: input, shape index: {}]   ;;  %s328_s1 = inlined_call_operand.vmem [shape: s32[20,1], index: 1, kind: input, shape index: {}]   ;;  %s329_s2 = inlined_call_operand.vmem [shape: f32[3,1,1], index: 2, kind: output, shape index: {}]  }
   0x1 LB: > { %s304_s10 = sadd.s32 4294967295, %s280_s9   ;;  %p254_p0 = scmp.ge.s32.totalorder %s280_s9, 1  ;;  %s280_s9 = sphi %s298_s9, %s12_s9  }
   0x2   : > { %p120_p1 = scmp.lt.s32.totalorder %s280_s9, 4 }
   0x4   : > { %p121_p2 = pnand %p254_p0, %p120_p1 }
   0x5   : > { %p143_p3 = scmp.lt.s32.totalorder (!%p121_p2), %s304_s10, 2  ;;  %s257_s19 = sshll.u32 (!%p121_p2), %s304_s10, 3 }
   0x6   : > { %124 = sbr.rel (%p121_p2) target bundleno = 344 (0x158), region = 28 }
   0xb   : > { %v282_v0 = vmov 0   ;;  %s310_s11 = scalar_select %p143_p3, %s304_s10, 2  ;;  %v156_v6 = vlaneseq  ;;  %v179_v13 = vstv %s257_s19  ;;  %vm189_vm2 = vcmask 0  }
   0xc   : > { %269 = vset.pattern.permute.xlu0 %v282_v0 }
   0xd   : > { %s255_s12 = sshll.u32 %s310_s11, 3  ;;  %v157_v7 = vand.u32 127, %v156_v6  ;;  %v177_v12 = vshrl.u32 %v156_v6, 7  ;;  %s153_s22 = scalar_lea.vmem %s329_s2, %s310_s11 }
   0xe   : > { %s146_s15 = scalar_lea.vmem %s327_s0, %s255_s12  ;;  %s150_s18 = scalar_lea.vmem %s328_s1, %s255_s12 }
   0xf   : > { %v154_v1 = vld [vmem:[%s146_s15] sm:$0xff]  ;;  %v180_v15 = vadd.s32 %v179_v13, %v177_v12 }
  0x10   : > { %165 = vmax.xlane.f32.xlu0 %v154_v1  ;;  %v155_v2 = vld [vmem:[%s150_s18] sm:$0xff] }
  0x11   : > { %vm181_vm1 = vcmp.lt.s32.totalorder %v180_v15, 20 }
  0x26   : > { %159 = vperm.xlu0 %269, %v155_v2  }
  0x99   : > { %v166_v3 = vpop.xlane.xlu0 %165 }
  0x9a   : > { %v167_v4 = vsub.f32 %v154_v1, %v166_v3 }
  0x9c   : > { %v168_v5 = vmul.f32 1.442695, %v167_v4 }
  0x9e   : > { %270 = vpow2.f32 %v168_v5 }
  0xa1   : > { %v160_v8 = vpop.permute.xlu0 %159 }
  0xa2   : > { %vm161_vm0 = vcmp.eq.s32.totalorder %v157_v7, %v160_v8 }
  0xa3   : > { %v162_v10 = vsel %vm161_vm0, %v154_v1, 0.0 }
  0xab   : > { %v271_v9 = vpop.eup %270 }
  0xac   : > { %170 = vadd.xlane.f32.xlu1 %v271_v9 }
  0xb0   : > { %163 = vadd.xlane.f32.xlu1 %v162_v10 }
 0x135   : > { %v171_v11 = vpop.xlane.xlu1 %170 }
 0x136   : > { %272 = vlog2.f32 %v171_v11 }
 0x139   : > { %v164_v17 = vpop.xlane.xlu1 %163 }
 0x143   : > { %v273_v14 = vpop.eup %272 }
 0x144   : > { %v173_v16 = vmul.f32 0.6931472, %v273_v14 }
 0x146   : > { %v174_v18 = vadd.f32 %v173_v16, %v166_v3 }
 0x148   : > { %v175_v19 = vsub.f32 %v174_v18, %v164_v17 }
 0x14a   : > { %v182_v20 = vsel %vm181_vm1, %v175_v19, 0.0 }
 0x14b   : > { %v183_v21 = vrot.slane %v182_v20, 4 }
 0x14d   : > { %v184_v22 = vadd.f32 %v183_v21, %v182_v20 }
 0x14f   : > { %v185_v23 = vrot.slane %v184_v22, 2 }
 0x151   : > { %v186_v24 = vadd.f32 %v185_v23, %v184_v22 }
 0x153   : > { %v187_v25 = vrot.slane %v186_v24, 1 }
 0x155   : > { %v188_v26 = vadd.f32 %v187_v25, %v186_v24 }
 0x157   : > { %190 = vst.msk [vmem:[%s153_s22] sm:$0x1] %vm189_vm2, %v188_v26 }
 0x158 PF: > { %s12_s9 = sadd.s32 1, %s280_s9  }
 0x159   : > { %p9_p4 = scmp.ge.s32.totalorder %s12_s9, 5  }
 0x15b   :  { %11 = sbr.rel (!%p9_p4) target bundleno = 1 (0x1), region = 61 }

</bundles_post_ra>
